<compile_context>
chip_gen: v6e
topology: v6e:2x2x1
jax: 0.10.0
libtpu: 0.0.40
codegen_flags: <defaults>
</compile_context>

<pallas_src>
import functools
from typing import NamedTuple

import jax
import jax.numpy as jnp
from jax.experimental import pallas as pl
from jax.experimental.pallas import tpu as pltpu

_LANE = 128
_SUBLANE = 8


def _round_up(n, m):
    return ((n + m - 1) // m) * m


class PolicyParams(NamedTuple):
    """Padded, matmul-native ([in, out]) parameters.

    Build once per policy update with `prepare_policy_params`; reuse for every
    forward call (the re-layout is real device work, not trace-time free).
    """
    w1t: jax.Array   # [S,  Hp]  matmul dtype
    b1p: jax.Array   # [1,  Hp]  f32
    w2t: jax.Array   # [Hp, Ap]  matmul dtype
    b2p: jax.Array   # [1,  Ap]  f32 (padded action columns biased to -1e30)


def prepare_policy_params(w1, b1, w2, b2, *, matmul_dtype=jnp.bfloat16):
    """Re-layout PyTorch nn.Linear weights ([out, in]) into padded [in, out].

    w1: [hidden_dim, state_dim], b1: [hidden_dim]
    w2: [action_dim, hidden_dim], b2: [action_dim]
    """
    H, S = w1.shape
    A = w2.shape[0]
    Hp = _round_up(H, _LANE)
    Ap = _round_up(A, _LANE)

    w1t = jnp.zeros((S, Hp), matmul_dtype).at[:, :H].set(w1.T.astype(matmul_dtype))
    b1p = jnp.zeros((1, Hp), jnp.float32).at[:, :H].set(
        b1.reshape(1, H).astype(jnp.float32))
    w2t = jnp.zeros((Hp, Ap), matmul_dtype).at[:H, :A].set(w2.T.astype(matmul_dtype))
    # Padded action logits get a -1e30 bias so exp() underflows to exactly 0
    # and they contribute nothing to the softmax denominator.
    b2p = jnp.full((1, Ap), -1e30, jnp.float32).at[:, :A].set(
        b2.reshape(1, A).astype(jnp.float32))
    return PolicyParams(w1t, b1p, w2t, b2p)


def _policy_kernel(x_ref, w1_ref, b1_ref, w2_ref, b2_ref, out_ref, *, action_dim):
    # fc1: [bt, S] @ [S, Hp] on the MXU, f32 accumulate; bias + relu in f32.
    x = x_ref[...].astype(w1_ref.dtype)
    h = jnp.dot(x, w1_ref[...], preferred_element_type=jnp.float32)     # [bt, Hp]
    h = jnp.maximum(h + b1_ref[...], 0.0)

    # fc2: [bt, Hp] @ [Hp, Ap]; padded action columns carry the -1e30 bias.
    logits = jnp.dot(h.astype(w2_ref.dtype), w2_ref[...],
                     preferred_element_type=jnp.float32)                # [bt, Ap]
    logits = logits + b2_ref[...]

    # Numerically stable softmax over the (padded) action dim; padded columns
    # contribute exactly 0 to the denominator. Exact division (not approx
    # reciprocal) so per-row probabilities sum to 1 to float precision.
    m = jnp.max(logits, axis=1, keepdims=True)
    e = jnp.exp(logits - m)
    denom = jnp.sum(e, axis=1, keepdims=True)
    # Store only the real action columns -> no padded-output HBM traffic.
    out_ref[...] = (e[:, :action_dim] / denom).astype(out_ref.dtype)


def _xla_forward(x, params: PolicyParams, action_dim):
    """Fused-XLA fallback for tiny batches (pallas_call fixed cost dominates)."""
    h = jnp.maximum(
        jnp.dot(x.astype(params.w1t.dtype), params.w1t,
                preferred_element_type=jnp.float32) + params.b1p, 0.0)
    logits = jnp.dot(h.astype(params.w2t.dtype), params.w2t,
                     preferred_element_type=jnp.float32) + params.b2p
    return jax.nn.softmax(logits[:, :action_dim], axis=1)


def policy_net_forward(x, params: PolicyParams, action_dim, *,
                       block_b=512, use_pallas=None):
    """Forward pass: softmax(relu(x @ W1 + b1) @ W2 + b2).

    x          : [B, state_dim]
    params     : PolicyParams from `prepare_policy_params` (built once)
    action_dim : number of real (unpadded) actions; static Python int
    Returns [B, action_dim] f32 probabilities.
    """
    B, S = x.shape
    Hp = params.w1t.shape[1]
    Ap = params.w2t.shape[1]

    if use_pallas is None:
        use_pallas = B >= 256
    if not use_pallas:
        return _xla_forward(x, params, action_dim)

    # Batch tile: sublane-aligned, capped at block_b, and sized so the grid has
    # >= 2 steps whenever possible (lets v7x shard the batch across both TCs).
    bt = max(_SUBLANE, min(block_b, _round_up(pl.cdiv(B, 2), _SUBLANE)))
    grid = (pl.cdiv(B, bt),)

    kernel = functools.partial(_policy_kernel, action_dim=action_dim)
    return pl.pallas_call(
        kernel,
        out_shape=jax.ShapeDtypeStruct((B, action_dim), jnp.float32),
        grid_spec=pltpu.PrefetchScalarGridSpec(
            num_scalar_prefetch=0,
            grid=grid,
            in_specs=[
                # Streamed x tile (ragged last tile: extra rows are discarded
                # on the output side; no cross-row reduction in the kernel).
                # If input DMA shows exposed at huge B, add
                # pipeline_mode=pl.Buffered(3) here.
                pl.BlockSpec((bt, S), lambda i: (i, 0)),
                pl.BlockSpec((S, Hp), lambda i: (0, 0)),    # W1, VMEM-resident
                pl.BlockSpec((1, Hp), lambda i: (0, 0)),    # b1, resident
                pl.BlockSpec((Hp, Ap), lambda i: (0, 0)),   # W2, resident
                pl.BlockSpec((1, Ap), lambda i: (0, 0)),    # b2, resident
            ],
            out_specs=pl.BlockSpec((bt, action_dim), lambda i: (i, 0)),
        ),
        compiler_params=pltpu.CompilerParams(
            dimension_semantics=("parallel",),      # megacore-shardable on v7x
            vmem_limit_bytes=32 * 1024 * 1024,      # ample; fits v7x 64MiB VMEM
        ),
    )(x, params.w1t, params.b1p, params.w2t, params.b2p)


def init_params(key, state_dim, hidden_dim, action_dim):
    """PyTorch-Linear-style uniform(-1/sqrt(fan_in), 1/sqrt(fan_in)) init."""
    k1, k2, k3, k4 = jax.random.split(key, 4)
    lim1 = 1.0 / jnp.sqrt(jnp.float32(state_dim))
    lim2 = 1.0 / jnp.sqrt(jnp.float32(hidden_dim))
    w1 = jax.random.uniform(k1, (hidden_dim, state_dim), jnp.float32, -lim1, lim1)
    b1 = jax.random.uniform(k2, (hidden_dim,), jnp.float32, -lim1, lim1)
    w2 = jax.random.uniform(k3, (action_dim, hidden_dim), jnp.float32, -lim2, lim2)
    b2 = jax.random.uniform(k4, (action_dim,), jnp.float32, -lim2, lim2)
    return w1, b1, w2, b2


if __name__ == "__main__":
    # Small shapes consistent with a TRPO policy net.
    batch, state_dim, hidden_dim, action_dim = 4, 8, 32, 4

    key = jax.random.PRNGKey(0)
    kx, kp = jax.random.split(key)
    x = jax.random.normal(kx, (batch, state_dim), dtype=jnp.float32)
    w1, b1, w2, b2 = init_params(kp, state_dim, hidden_dim, action_dim)

    # One-time weight re-layout (once per policy update, not per forward).
    params_bf16 = prepare_policy_params(w1, b1, w2, b2, matmul_dtype=jnp.bfloat16)
    params_f32 = prepare_policy_params(w1, b1, w2, b2, matmul_dtype=jnp.float32)

    # Force the Pallas path even at this tiny batch so the kernel is exercised.
    fwd = jax.jit(functools.partial(policy_net_forward,
                                    action_dim=action_dim, use_pallas=True))

    probs = jax.block_until_ready(fwd(x, params_bf16))

    # Plain-JAX f32 reference (same math as the PyTorch module).
    h_ref = jnp.maximum(x @ w1.T + b1[None, :], 0.0)
    ref = jax.nn.softmax(h_ref @ w2.T + b2[None, :], axis=1)

    assert probs.shape == (batch, action_dim)
    assert jnp.allclose(jnp.sum(probs, axis=1), 1.0, atol=1e-3), jnp.sum(probs, axis=1)
    # bf16 MXU operands (f32 accumulate) => loose tolerance vs f32 reference.
    assert jnp.allclose(probs, ref, atol=2e-2, rtol=2e-2), (
        f"max abs err {float(jnp.max(jnp.abs(probs - ref)))}")

    # f32 MXU path: tight tolerance (exact division, f32 everywhere).
    probs32 = jax.block_until_ready(fwd(x, params_f32))
    assert jnp.allclose(probs32, ref, atol=1e-4, rtol=1e-4), (
        f"max abs err {float(jnp.max(jnp.abs(probs32 - ref)))}")
    assert jnp.allclose(jnp.sum(probs32, axis=1), 1.0, atol=1e-5)

    print("KERNEL_OK")
</pallas_src>

<mosaic_0001>
module attributes {stable_mosaic.version = 11 : i64} {
  func.func @_policy_kernel(%arg0: i32, %arg1: memref<8x8xf32, #tpu.memory_space<vmem>>, %arg2: memref<8x128xbf16, #tpu.memory_space<vmem>>, %arg3: memref<1x128xf32, #tpu.memory_space<vmem>>, %arg4: memref<128x128xbf16, #tpu.memory_space<vmem>>, %arg5: memref<1x128xf32, #tpu.memory_space<vmem>>, %arg6: memref<8x4xf32, #tpu.memory_space<vmem>>) attributes {dimension_semantics = [#tpu.dimension_semantics<parallel>], iteration_bounds = array<i64: 1>, scalar_prefetch = 0 : i64, scratch_operands = 0 : i64, tpu.core_type = #tpu.core_type<tc>, window_params = [{transform_indices = @transform_0, window_bounds = array<i64: 8, 8>}, {pipeline_mode = #tpu.pipeline_mode<synchronous>, transform_indices = @transform_1, window_bounds = array<i64: 8, 128>}, {pipeline_mode = #tpu.pipeline_mode<synchronous>, transform_indices = @transform_2, window_bounds = array<i64: 1, 128>}, {pipeline_mode = #tpu.pipeline_mode<synchronous>, transform_indices = @transform_3, window_bounds = array<i64: 128, 128>}, {pipeline_mode = #tpu.pipeline_mode<synchronous>, transform_indices = @transform_4, window_bounds = array<i64: 1, 128>}, {transform_indices = @transform_5, window_bounds = array<i64: 8, 4>}]} {
    %c0 = arith.constant 0 : index
    %c0_0 = arith.constant 0 : index
    %0 = vector.load %arg1[%c0, %c0_0] : memref<8x8xf32, #tpu.memory_space<vmem>>, vector<8x8xf32>
    %1 = arith.truncf %0 : vector<8x8xf32> to vector<8x8xbf16>
    %c0_1 = arith.constant 0 : index
    %c0_2 = arith.constant 0 : index
    %2 = vector.load %arg2[%c0_1, %c0_2] : memref<8x128xbf16, #tpu.memory_space<vmem>>, vector<8x128xbf16>
    %cst = arith.constant dense<0.000000e+00> : vector<8x128xf32>
    %3 = tpu.matmul %1, %2, %cst {dimension_numbers = #tpu.dot_dimension_numbers<[1], [0], [0], [1], [0, 0, 1, 1], [], []>} : vector<8x8xbf16>, vector<8x128xbf16>, vector<8x128xf32> -> vector<8x128xf32>
    %c0_3 = arith.constant 0 : index
    %c0_4 = arith.constant 0 : index
    %4 = vector.load %arg3[%c0_3, %c0_4] : memref<1x128xf32, #tpu.memory_space<vmem>>, vector<1x128xf32>
    %5 = vector.broadcast %4 : vector<1x128xf32> to vector<8x128xf32>
    %6 = arith.addf %3, %5 : vector<8x128xf32>
    %cst_5 = arith.constant 0.000000e+00 : f32
    %7 = vector.broadcast %cst_5 : f32 to vector<8x128xf32>
    %8 = arith.maximumf %6, %7 : vector<8x128xf32>
    %9 = arith.truncf %8 : vector<8x128xf32> to vector<8x128xbf16>
    %c0_6 = arith.constant 0 : index
    %c0_7 = arith.constant 0 : index
    %10 = vector.load %arg4[%c0_6, %c0_7] : memref<128x128xbf16, #tpu.memory_space<vmem>>, vector<128x128xbf16>
    %cst_8 = arith.constant dense<0.000000e+00> : vector<8x128xf32>
    %11 = tpu.matmul %9, %10, %cst_8 {dimension_numbers = #tpu.dot_dimension_numbers<[1], [0], [0], [1], [0, 0, 1, 1], [], []>} : vector<8x128xbf16>, vector<128x128xbf16>, vector<8x128xf32> -> vector<8x128xf32>
    %c0_9 = arith.constant 0 : index
    %c0_10 = arith.constant 0 : index
    %12 = vector.load %arg5[%c0_9, %c0_10] : memref<1x128xf32, #tpu.memory_space<vmem>>, vector<1x128xf32>
    %13 = vector.broadcast %12 : vector<1x128xf32> to vector<8x128xf32>
    %14 = arith.addf %11, %13 : vector<8x128xf32>
    %cst_11 = arith.constant dense<0xFF800000> : vector<8xf32>
    %15 = vector.multi_reduction <maximumf>, %14, %cst_11 [1] : vector<8x128xf32> to vector<8xf32>
    %16 = vector.shape_cast %15 : vector<8xf32> to vector<8x1xf32>
    %17 = vector.broadcast %16 : vector<8x1xf32> to vector<8x128xf32>
    %18 = arith.subf %14, %17 : vector<8x128xf32>
    %19 = math.exp %18 : vector<8x128xf32>
    %cst_12 = arith.constant dense<0.000000e+00> : vector<8xf32>
    %20 = vector.multi_reduction <add>, %19, %cst_12 [1] : vector<8x128xf32> to vector<8xf32>
    %21 = vector.shape_cast %20 : vector<8xf32> to vector<8x1xf32>
    %22 = vector.extract_strided_slice %19 {offsets = [0, 0], sizes = [8, 4], strides = [1, 1]} : vector<8x128xf32> to vector<8x4xf32>
    %23 = vector.broadcast %21 : vector<8x1xf32> to vector<8x4xf32>
    %24 = arith.divf %22, %23 : vector<8x4xf32>
    %c0_13 = arith.constant 0 : index
    %c0_14 = arith.constant 0 : index
    %25 = vector.load %arg6[%c0_13, %c0_14] : memref<8x4xf32, #tpu.memory_space<vmem>>, vector<8x4xf32>
    tpu.vector_store %arg6[%c0_13, %c0_14], %24 {strides = array<i32>} : memref<8x4xf32, #tpu.memory_space<vmem>>, vector<8x4xf32>,
    return
  }
  func.func @transform_0(%arg0: i32) -> (i32, i32) {
    %c0_i32 = arith.constant 0 : i32
    %c0_i32_0 = arith.constant 0 : i32
    return %arg0, %c0_i32 : i32, i32
  }
  func.func @transform_1(%arg0: i32) -> (i32, i32) {
    %c0_i32 = arith.constant 0 : i32
    %c0_i32_0 = arith.constant 0 : i32
    %c0_i32_1 = arith.constant 0 : i32
    return %c0_i32, %c0_i32_0 : i32, i32
  }
  func.func @transform_2(%arg0: i32) -> (i32, i32) {
    %c0_i32 = arith.constant 0 : i32
    %c0_i32_0 = arith.constant 0 : i32
    %c0_i32_1 = arith.constant 0 : i32
    return %c0_i32, %c0_i32_0 : i32, i32
  }
  func.func @transform_3(%arg0: i32) -> (i32, i32) {
    %c0_i32 = arith.constant 0 : i32
    %c0_i32_0 = arith.constant 0 : i32
    %c0_i32_1 = arith.constant 0 : i32
    return %c0_i32, %c0_i32_0 : i32, i32
  }
  func.func @transform_4(%arg0: i32) -> (i32, i32) {
    %c0_i32 = arith.constant 0 : i32
    %c0_i32_0 = arith.constant 0 : i32
    %c0_i32_1 = arith.constant 0 : i32
    return %c0_i32, %c0_i32_0 : i32, i32
  }
  func.func @transform_5(%arg0: i32) -> (i32, i32) {
    %c0_i32 = arith.constant 0 : i32
    %c0_i32_0 = arith.constant 0 : i32
    return %arg0, %c0_i32 : i32, i32
  }
}

</mosaic_0001>

<bundles_post_ra>
// kernel: policy_net_forward.1
= control target key start
LH: loop header
LB: loop body
LE: loop exit
PB: predicated region body
PF: predicated region fallthrough
CT: control target
= control target key end

     0   :  { %10 = vsyncpa [#allocation3], 0  ;;  %s480_s0 = inlined_call_operand.hbm [shape: f32[4,8], index: 0, kind: input, shape index: {}]   ;;  %s481_s1 = inlined_call_operand.hbm [shape: bf16[8,128], index: 1, kind: input, shape index: {}]   ;;  %s482_s2 = inlined_call_operand.vmem [shape: f32[1,128], index: 2, kind: input, shape index: {}]   ;;  %s483_s3 = inlined_call_operand.hbm [shape: bf16[128,128], index: 3, kind: input, shape index: {}]   ;;  %s484_s4 = inlined_call_operand.vmem [shape: f32[1,128], index: 4, kind: input, shape index: {}]   ;;  %s485_s5 = inlined_call_operand.hbm [shape: f32[4,4], index: 5, kind: output, shape index: {}]  }
   0x1   :  { %11 = vsyncpa [#allocation6], 0 }
   0x2   :  { %12 = vsyncpa [#allocation4], 0 }
   0x3   :  { %17 = vsyncadd [#allocation3], 64  ;;  %s415_s18 = smov [#allocation5]   ;;  %s416_s20 = smov [#allocation2]  }
   0x4   :  { %s31_s19 = sshll.u32 %s415_s18, 4  ;;  %s18_s21 = sshll.u32 %s416_s20, 4  ;;  %s32_s19 = int_to_ptr.vmem [resolvable:$true] %s31_s19  ;;  %s19_s21 = int_to_ptr.vmem [resolvable:$true] %s18_s21 }
   0x5   :  { %s337_s22 = scalar_lea.vmem %s32_s19, 64  ;;  %p342_p1 = scmp.lt.s32.totalorder %s32_s19, %s32_s19 }
   0x6   :  { %p338_p0 = scmp.ne.s32.totalorder %s32_s19, %s337_s22  ;;  %p343_p2 = scmp.lt.s32.totalorder %s337_s22, %s337_s22 }
   0x8   :  { %p344_p3 = por %p343_p2, %p342_p1 }
   0xa   :  { %p345_p4 = pnand %p344_p3, %p338_p0 }
   0xc   :  { %348 = shalt.err (!%p345_p4)
}
   0xd   :  { %34 = dma.hbm_to_vmem [thread:$0]  %s481_s1, 64, %s32_s19, [#allocation6]  }
   0xe   :  { %s357_s25 = scalar_lea.vmem %s19_s21, 64  ;;  %s361_s26 = scalar_lea.vmem %s19_s21, 128 }
   0xf   :  { %p358_p5 = scmp.ne.s32.totalorder %s19_s21, %s357_s25  ;;  %p362_p6 = scmp.lt.s32.totalorder %s19_s21, %s19_s21 }
  0x10   :  { %p363_p7 = scmp.lt.s32.totalorder %s361_s26, %s357_s25 }
  0x12   :  { %p364_p8 = por %p363_p7, %p362_p6 }
  0x14   :  { %p365_p9 = pnand %p364_p8, %p358_p5 }
  0x16   :  { %368 = shalt.err (!%p365_p9)
}
  0x17   :  { %s417_s27 = smov 64   ;;  %s418_s28 = smov 4  }
  0x18   :  { %24 = dma.hbm_to_vmem [thread:$0]  %s480_s0, 64, %s19_s21, [#allocation3], %s417_s27, %s417_s27, %s418_s28  }
  0x19   :  { %s419_s6 = smov [#allocation7]  }
  0x1a   :  { %s42_s7 = sshll.u32 %s419_s6, 4  ;;  %s43_s7 = int_to_ptr.vmem [resolvable:$true] %s42_s7 }
  0x1b   :  { %s377_s1 = scalar_lea.vmem %s43_s7, 1024  ;;  %p382_p11 = scmp.lt.s32.totalorder %s43_s7, %s43_s7 }
  0x1c   :  { %p378_p10 = scmp.ne.s32.totalorder %s43_s7, %s377_s1  ;;  %p383_p12 = scmp.lt.s32.totalorder %s377_s1, %s377_s1 }
  0x1e   :  { %p384_p13 = por %p383_p12, %p382_p11 }
  0x20   :  { %p385_p0 = pnand %p384_p13, %p378_p10 }
  0x22   :  { %388 = shalt.err (!%p385_p0)
}
  0x23   :  { %48 = dma.hbm_to_vmem [thread:$0]  %s483_s3, 1024, %s43_s7, [#allocation6], %s417_s27, %s417_s27, %s418_s28  }
  0x24   :  { %409 = dma.done.wait [#allocation3], 128  }
  0x25   :  { %410 = vsyncadd [#allocation3], 4294967168 }
  0x26   :  { %411 = dma.done.wait [#allocation6], 1088  }
  0x27   :  { %412 = vsyncadd [#allocation6], 4294966208  ;;  %v420_v0 = vmov 0.0   ;;  %vm421_vm0 = vmmov 0   ;;  %vm75_vm1 = vcmask 1043456   ;;  %v61_v2 = vld [vmem:[#allocation2] sm:$0xff] }
  0x28   :  { %283 = vmatprep.subr.bf16.mxu0 %v420_v0  ;;  %285 = vmatprep.mubr.msk.bf16.mxu0 %vm421_vm0, %v420_v0  ;;  %v63_v1 = vld [vmem:[#allocation5] sm:$0xf]  ;;  %v62_v4 = vpack.c.bf16 %v61_v2, %v61_v2  ;;  %vm71_vm2 = vcmask 64512   ;;  %v318_v6 = vld [vmem:[#allocation7 + $0x30] sm:$0xff]   ;;  %v319_v7 = vld [vmem:[#allocation7 + $0x28] sm:$0xff]   ;;  %vm241_vm3 = vcmask 31744  }
  0x29   :  { %289 = vmatprep.subr.bf16.mxu1 %v420_v0  ;;  %305 = vmatprep.mubr.msk.bf16.mxu1 %vm421_vm0, %v420_v0  ;;  %v77_v3 = vsel %vm75_vm1, %v63_v1, 0  ;;  %v317_v5 = vld [vmem:[#allocation7 + $0x38] sm:$0xff]   ;;  %v320_v8 = vld [vmem:[#allocation7 + $0x20] sm:$0xff]   ;;  %v322_v10 = vld [vmem:[#allocation7 + $0x10] sm:$0xff]  }
  0x2a   :  { %284 = vmatpush3.bf16.msra.mxu0 %v77_v3  ;;  %290 = vmatpush3.bf16.msra.mxu1 %v317_v5  ;;  %v321_v9 = vld [vmem:[#allocation7 + $0x18] sm:$0xff]   ;;  %v323_v11 = vld [vmem:[#allocation7 + $0x8] sm:$0xff]   ;;  %v324_v12 = vld [vmem:[#allocation7] sm:$0xff]  }
  0x2b   :  { %291 = vmatprep.subr.bf16.mxu1 %v420_v0  ;;  %v261_v13 = vld [vmem:[%s482_s2] ss:$0 sm:$0xff] }
  0x2c   :  { %v263_v21 = vld [vmem:[%s484_s4] ss:$0 sm:$0xff] }
  0x2d   :  { %286 = vmatmul.mubr.msk.bf16.vlgmr.msra.gmra.mxu0 %vm71_vm2, %v62_v4 }
  0x2e   :  { %292 = vmatpush3.bf16.msra.mxu1 %v318_v6 }
  0x2f   :  { %293 = vmatprep.subr.bf16.mxu1 %v420_v0 }
  0x32   :  { %294 = vmatpush3.bf16.msra.mxu1 %v319_v7 }
  0x33   :  { %295 = vmatprep.subr.bf16.mxu1 %v420_v0 }
  0x36   :  { %296 = vmatpush3.bf16.msra.mxu1 %v320_v8 }
  0x37   :  { %297 = vmatprep.subr.bf16.mxu1 %v420_v0 }
  0x3a   :  { %298 = vmatpush3.bf16.msra.mxu1 %v321_v9 }
  0x3b   :  { %299 = vmatprep.subr.bf16.mxu1 %v420_v0 }
  0x3e   :  { %300 = vmatpush3.bf16.msra.mxu1 %v322_v10 }
  0x3f   :  { %301 = vmatprep.subr.bf16.mxu1 %v420_v0 }
  0x42   :  { %302 = vmatpush3.bf16.msra.mxu1 %v323_v11 }
  0x43   :  { %303 = vmatprep.subr.bf16.mxu1 %v420_v0 }
  0x46   :  { %304 = vmatpush3.bf16.msra.mxu1 %v324_v12 }
  0xed   :  { %v113_v14 = vpop.f32.mrf.mxu0 }
  0xee   :  { %v114_v15 = vadd.f32 %v261_v13, %v113_v14 }
  0xef   :  { %v287_v16 = vpop.f32.mrf.mxu0 }
  0xf0   :  { %v119_v17 = vmax.f32 %v114_v15, 0.0 }
  0xf1   :  { %v116_v18 = vpop.f32.mrf.mxu0 }
  0xf2   :  { %v120_v19 = vpack.c.bf16 %v119_v17, %v119_v17 }
  0xf3   :  { %v288_v20 = vpop.f32.mrf.mxu0 }
  0xf4   :  { %306 = vmatmul.mubr.bf16.vlgmr.msra.gmra.mxu1 %v120_v19 }
 0x1b4   :  { %v226_v22 = vpop.f32.mrf.mxu1 }
 0x1b5   :  { %v227_v23 = vadd.f32 %v263_v21, %v226_v22 }
 0x1b6   :  { %v307_v24 = vpop.f32.mrf.mxu1 }
 0x1b7   :  { %232 = vmax.xlane.f32.xlu0 %v227_v23 }
 0x1b8   :  { %v229_v25 = vpop.f32.mrf.mxu1 }
 0x1ba   :  { %v308_v26 = vpop.f32.mrf.mxu1 }
 0x240   :  { %v233_v27 = vpop.xlane.xlu0 %232 }
 0x241   :  { %v234_v28 = vsub.f32 %v227_v23, %v233_v27 }
 0x243   :  { %v235_v29 = vmul.f32 1.442695, %v234_v28 }
 0x245   :  { %325 = vpow2.f32 %v235_v29 }
 0x252   :  { %v326_v30 = vpop.eup %325 }
 0x253   :  { %237 = vadd.xlane.f32.xlu0 %v326_v30 }
 0x2dc   :  { %v238_v31 = vpop.xlane.xlu0 %237 }
 0x2dd   :  { %327 = vrcp.f32 %v238_v31 }
 0x2ea   :  { %v328_v32 = vpop.eup %327 }
 0x2eb   :  { %v240_v33 = vmul.f32 %v328_v32, %v326_v30 }
 0x2ed   :  { %242 = vst.msk [vmem:[#allocation8] sm:$0xff] %vm241_vm3, %v240_v33 }
 0x2ee   :  { %247 = vsyncadd [#allocation4], 64  ;;  %s422_s2 = smov [#allocation8]  }
 0x2ef   :  { %s248_s4 = sshll.u32 %s422_s2, 4  ;;  %s249_s4 = int_to_ptr.vmem [resolvable:$true] %s248_s4 }
 0x2f0   :  { %s389_s12 = scalar_lea.vmem %s249_s4, 64  ;;  %s393_s13 = scalar_lea.vmem %s249_s4, 128 }
 0x2f1   :  { %p390_p1 = scmp.ne.s32.totalorder %s249_s4, %s389_s12  ;;  %p394_p2 = scmp.lt.s32.totalorder %s249_s4, %s249_s4 }
 0x2f2   :  { %p395_p3 = scmp.lt.s32.totalorder %s393_s13, %s389_s12 }
 0x2f4   :  { %p396_p4 = por %p395_p3, %p394_p2 }
 0x2f6   :  { %p397_p5 = pnand %p396_p4, %p390_p1 }
 0x2f8   :  { %400 = shalt.err (!%p397_p5)
}
 0x2f9   :  { %254 = dma.vmem_to_hbm [thread:$0]  %s249_s4, 64, %s485_s5, [#allocation4], %s417_s27, %s417_s27, %s418_s28  }
 0x2fa   :  { %413 = dma.done.wait [#allocation4], 128  }
 0x2fb   :  { %414 = vsyncadd [#allocation4], 4294967168 }
 0x2fc   :  { %258 = vsyncpa [#allocation3], 1 }
 0x2fd   :  { %259 = vsyncpa [#allocation6], 1 }
 0x2fe   :  { %260 = vsyncpa [#allocation4], 1 }

</bundles_post_ra>
